<compile_context>
chip_gen: v7x
topology: tpu7x:2x2x1
jax: 0.10.0
libtpu: 0.0.40
codegen_flags: <defaults>
</compile_context>

<pallas_src>
import jax
import jax.numpy as jnp
from jax.experimental import pallas as pl
from jax.experimental.pallas import tpu as pltpu


# ---------------------------------------------------------------------------
# Glue: einops-equivalent rearranges (pure JAX, no compute)
# ---------------------------------------------------------------------------
def space_to_depth(x, blk):
    # rearrange('B C (h b1) (w b2) -> B h w (C b1 b2)', b1=blk, b2=blk)
    B, C, H, W = x.shape
    h, w = H // blk, W // blk
    x = x.reshape(B, C, h, blk, w, blk)
    x = jnp.transpose(x, (0, 2, 4, 1, 3, 5))  # B h w C b1 b2
    return x.reshape(B, h, w, C * blk * blk)


def depth_to_space(xb, blk, C):
    # rearrange('B h w (C b1 b2) -> B C (h b1) (w b2)', b1=blk, b2=blk)
    B, h, w, _ = xb.shape
    x = xb.reshape(B, h, w, C, blk, blk)
    x = jnp.transpose(x, (0, 3, 1, 4, 2, 5))  # B C h b1 w b2
    return x.reshape(B, C, h * blk, w * blk)


def _round_up(x, m):
    return (x + m - 1) // m * m


def _pad2d(a, rows, cols):
    r, c = a.shape
    if r == rows and c == cols:
        return a
    return jnp.pad(a, ((0, rows - r), (0, cols - c)))


# ---------------------------------------------------------------------------
# Pallas kernels
# ---------------------------------------------------------------------------
_COMPUTE_DTYPE = jnp.bfloat16
_DEFAULT_TM = 512  # per perf review: sweep 512-1024; footprint stays < 10 MiB


def _matmul_kernel(x_ref, w_ref, o_ref):
    # (tm, K) @ (K, N) -> (tm, N); bf16 operands, f32 accumulation on MXU.
    x = x_ref[...].astype(_COMPUTE_DTYPE)
    o_ref[...] = jnp.dot(
        x, w_ref[...], preferred_element_type=jnp.float32
    ).astype(o_ref.dtype)


def _fused_kernel(x_ref, phi_ref, psi_ref, y_ref, x0_ref):
    # y = xb @ phi (kept on-chip), x0 = y @ psi — both per row tile.
    x = x_ref[...].astype(_COMPUTE_DTYPE)
    y_acc = jnp.dot(x, phi_ref[...], preferred_element_type=jnp.float32)
    y_bf = y_acc.astype(_COMPUTE_DTYPE)          # cast once, reused below
    y_ref[...] = y_acc.astype(y_ref.dtype)
    x0_ref[...] = jnp.dot(
        y_bf, psi_ref[...], preferred_element_type=jnp.float32
    ).astype(x0_ref.dtype)


# ---------------------------------------------------------------------------
# Wrapper helpers
# ---------------------------------------------------------------------------
def _pick_tm(R, tm_max):
    """Row tile: sublane-aligned, and >=2 grid steps when R allows (v7x 2 TCs)."""
    half = _round_up(pl.cdiv(R, 2), 8)
    tm_eff = max(min(tm_max, half), 8)
    if tm_eff >= R:
        tm_eff = R  # single full-extent block (any R, incl. non-multiples of 8)
    return tm_eff


def _vmem_limit(*buffer_bytes):
    total = sum(buffer_bytes)
    # 1.5x + 4 MiB headroom for compiler scratch; floor 16 MiB; cap at v7x's
    # 64 MiB physical VMEM so sweeps done on v5e/v6e stay deployable on v7x.
    return int(min(max(int(total * 1.5) + (4 << 20), 16 << 20), 64 << 20))


# ---------------------------------------------------------------------------
# Pallas wrappers
# ---------------------------------------------------------------------------
def block_matmul(x2d, w, *, tm=_DEFAULT_TM, out_dtype=jnp.float32):
    """(R, K) @ (K, N) -> (R, N). Row-streamed LHS, weight fully VMEM-resident."""
    R, K = x2d.shape
    K2, N = w.shape
    assert K == K2

    Kp = _round_up(K, 128)
    Np = _round_up(N, 128)
    tm_eff = _pick_tm(R, tm)

    # Only pad the contraction dim of x when K isn't lane-aligned (rare; for
    # blk_size=32 it already is).  No row padding: grid is ragged-safe.
    if Kp != K:
        x2d = jnp.pad(x2d, ((0, 0), (0, Kp - K)))
    w_p = _pad2d(w.astype(_COMPUTE_DTYPE), Kp, Np)

    x_bytes = jnp.dtype(x2d.dtype).itemsize
    o_bytes = jnp.dtype(out_dtype).itemsize
    vmem = _vmem_limit(
        2 * tm_eff * Kp * x_bytes,   # double-buffered streamed rows
        2 * Kp * Np * 2,             # resident weight (count 2x to be safe)
        2 * tm_eff * Np * o_bytes,   # double-buffered output tile
    )
    cost = pl.CostEstimate(
        flops=2 * R * Kp * Np,
        transcendentals=0,
        bytes_accessed=int(R * Kp * x_bytes + Kp * Np * 2 + R * Np * o_bytes),
    )

    out = pl.pallas_call(
        _matmul_kernel,
        out_shape=jax.ShapeDtypeStruct((R, Np), out_dtype),
        grid_spec=pltpu.PrefetchScalarGridSpec(
            num_scalar_prefetch=0,
            grid=(pl.cdiv(R, tm_eff),),
            in_specs=[
                pl.BlockSpec((tm_eff, Kp), lambda i: (i, 0)),  # streamed rows
                pl.BlockSpec((Kp, Np), lambda i: (0, 0)),      # resident weight
            ],
            out_specs=pl.BlockSpec((tm_eff, Np), lambda i: (i, 0)),
        ),
        compiler_params=pltpu.CompilerParams(
            dimension_semantics=("parallel",),
            vmem_limit_bytes=vmem,
        ),
        cost_estimate=cost,
    )(x2d, w_p)
    return out if Np == N else out[:, :N]


def fused_measure_reconstruct(x2d, phi, psi, *, tm=_DEFAULT_TM,
                              y_dtype=jnp.float32, x0_dtype=jnp.bfloat16):
    """y = x2d @ phi; x0 = y @ psi  in one kernel (y stays on-chip)."""
    R, N = x2d.shape
    N2, M = phi.shape
    M2, N3 = psi.shape
    assert N == N2 and M == M2 and N == N3

    Np = _round_up(N, 128)
    Mp = _round_up(M, 128)
    tm_eff = _pick_tm(R, tm)

    if Np != N:
        x2d = jnp.pad(x2d, ((0, 0), (0, Np - N)))
    phi_p = _pad2d(phi.astype(_COMPUTE_DTYPE), Np, Mp)
    psi_p = _pad2d(psi.astype(_COMPUTE_DTYPE), Mp, Np)

    x_bytes = jnp.dtype(x2d.dtype).itemsize
    y_bytes = jnp.dtype(y_dtype).itemsize
    x0_bytes = jnp.dtype(x0_dtype).itemsize
    vmem = _vmem_limit(
        2 * tm_eff * Np * x_bytes,
        2 * Np * Mp * 2, 2 * Mp * Np * 2,       # resident phi/psi
        2 * tm_eff * Mp * y_bytes,
        2 * tm_eff * Np * x0_bytes,
    )
    cost = pl.CostEstimate(
        flops=4 * R * Np * Mp,
        transcendentals=0,
        bytes_accessed=int(
            R * Np * x_bytes + 2 * Np * Mp * 2 + R * Mp * y_bytes + R * Np * x0_bytes
        ),
    )

    y_pad, x0_pad = pl.pallas_call(
        _fused_kernel,
        out_shape=(
            jax.ShapeDtypeStruct((R, Mp), y_dtype),
            jax.ShapeDtypeStruct((R, Np), x0_dtype),
        ),
        grid_spec=pltpu.PrefetchScalarGridSpec(
            num_scalar_prefetch=0,
            grid=(pl.cdiv(R, tm_eff),),
            in_specs=[
                pl.BlockSpec((tm_eff, Np), lambda i: (i, 0)),  # streamed rows
                pl.BlockSpec((Np, Mp), lambda i: (0, 0)),      # resident phi
                pl.BlockSpec((Mp, Np), lambda i: (0, 0)),      # resident psi
            ],
            out_specs=[
                pl.BlockSpec((tm_eff, Mp), lambda i: (i, 0)),
                pl.BlockSpec((tm_eff, Np), lambda i: (i, 0)),
            ],
        ),
        compiler_params=pltpu.CompilerParams(
            dimension_semantics=("parallel",),
            vmem_limit_bytes=vmem,
        ),
        cost_estimate=cost,
    )(x2d, phi_p, psi_p)
    y = y_pad if Mp == M else y_pad[:, :M]
    x0 = x0_pad if Np == N else x0_pad[:, :N]
    return y, x0


# ---------------------------------------------------------------------------
# Base module (JAX/Pallas port)
# ---------------------------------------------------------------------------
class BasePallas:
    def __init__(self, sr, blk_size=32, channels=1):
        self.sr = sr
        self.blk_size = blk_size
        self.channels = channels
        self.phi = None
        self.psi = None
        self.phi_T = None

    def setup_phi_psi(self, matrix):
        # PyTorch: phi = matrix.T, psi = matrix. phi.T is cached once here.
        matrix = jnp.asarray(matrix, jnp.float32)   # (M, N)
        self.phi = matrix.T                         # (N, M)
        self.psi = matrix                           # (M, N)
        self.phi_T = matrix                         # cached phi.T

    def space_to_depth(self, x):
        return space_to_depth(x, self.blk_size)

    def depth_to_space(self, xb):
        return depth_to_space(xb, self.blk_size, self.channels)

    def sampling_measure(self, x):
        # Canonical y = space_to_depth(x) @ phi measurement used by subclasses
        # (Base.sampling itself is abstract).
        xb = self.space_to_depth(x).astype(_COMPUTE_DTYPE)  # cast fuses w/ transpose
        B, h, w, N = xb.shape
        y2d = block_matmul(xb.reshape(B * h * w, N), self.phi)
        return y2d.reshape(B, h, w, self.phi.shape[1])

    def init_reconstruction(self, y, phi_T=False):
        # x0 = y @ phi.T  (if phi_T) else  y @ psi ; then depth_to_space
        B, h, w, M = y.shape
        wmat = self.phi_T if phi_T else self.psi    # (M, N)
        x0_2d = block_matmul(y.reshape(B * h * w, M), wmat)
        x0 = x0_2d.reshape(B, h, w, wmat.shape[1])
        return self.depth_to_space(x0)

    def sample_and_reconstruct(self, x):
        # Fused hot path: y = xb@phi and x0 = y@psi in one pallas_call
        # (the intermediate y never round-trips through HBM, x0 stored bf16).
        xb = self.space_to_depth(x).astype(_COMPUTE_DTYPE)
        B, h, w, N = xb.shape
        y2d, x02d = fused_measure_reconstruct(
            xb.reshape(B * h * w, N), self.phi, self.psi
        )
        y = y2d.reshape(B, h, w, self.phi.shape[1])
        x0 = self.depth_to_space(x02d.reshape(B, h, w, N))
        return y, x0

    # TODO(synk): Base.forward / sampling / projection /
    # sampling_without_calc_saliency raise NotImplementedError in the PyTorch
    # reference (abstract hooks), so they are not implemented here.


# ---------------------------------------------------------------------------
# Demo / self-check
# ---------------------------------------------------------------------------
if __name__ == "__main__":
    # blk_size=32 -> h=w=3, R = B*h*w = 18 (multi-tile + ragged last tile),
    # sr=0.1 -> M=102 (exercises the non-128-multiple column-padding paths).
    B, C, H, W = 2, 1, 96, 96
    blk = 32
    sr = 0.1
    N = C * blk * blk
    M = int(round(sr * N))

    model = BasePallas(sr=sr, blk_size=blk, channels=C)
    key = jax.random.PRNGKey(0)
    matrix = jax.random.normal(key, (M, N), jnp.float32) / jnp.sqrt(jnp.float32(N))
    model.setup_phi_psi(matrix)

    x = jax.random.normal(jax.random.fold_in(key, 1), (B, C, H, W), jnp.float32)

    # measurement + init reconstruction (separate kernels)
    y = model.sampling_measure(x)                    # (2, 3, 3, 102)
    x0 = model.init_reconstruction(y, phi_T=False)   # (2, 1, 96, 96)
    x0_T = model.init_reconstruction(y, phi_T=True)
    # fused path
    y_f, x0_f = model.sample_and_reconstruct(x)
    x0 = jax.block_until_ready(x0)
    x0_T = jax.block_until_ready(x0_T)
    x0_f = jax.block_until_ready(x0_f)

    # pure-JAX reference using the same bf16-operand / f32-accumulate recipe
    xb_ref = space_to_depth(x, blk).astype(jnp.bfloat16)
    phi_bf = model.phi.astype(jnp.bfloat16)
    psi_bf = model.psi.astype(jnp.bfloat16)
    phiT_bf = model.phi_T.astype(jnp.bfloat16)
    y_ref = jnp.einsum("bhwn,nm->bhwm", xb_ref, phi_bf,
                       preferred_element_type=jnp.float32)
    y_ref_bf = y_ref.astype(jnp.bfloat16)
    x0b_ref = jnp.einsum("bhwm,mn->bhwn", y_ref_bf, psi_bf,
                         preferred_element_type=jnp.float32)
    x0bT_ref = jnp.einsum("bhwm,mn->bhwn", y_ref_bf, phiT_bf,
                          preferred_element_type=jnp.float32)
    x0_ref = depth_to_space(x0b_ref, blk, C)
    x0T_ref = depth_to_space(x0bT_ref, blk, C)

    assert y.shape == (B, 3, 3, M)
    assert x0.shape == (B, C, H, W)
    assert x0_T.shape == (B, C, H, W)
    assert jnp.allclose(y, y_ref, atol=2e-2, rtol=2e-2)
    assert jnp.allclose(x0, x0_ref, atol=2e-2, rtol=2e-2)
    assert jnp.allclose(x0_T, x0T_ref, atol=2e-2, rtol=2e-2)
    assert jnp.allclose(y_f, y, atol=2e-3, rtol=2e-3)
    assert jnp.allclose(x0_f, x0, atol=2e-2, rtol=2e-2)   # x0_f is bf16
    print("KERNEL_OK")
</pallas_src>

<mosaic_0001>
module attributes {stable_mosaic.version = 11 : i64} {
  func.func @_matmul_kernel(%arg0: i32, %arg1: memref<16x1024xbf16, #tpu.memory_space<vmem>>, %arg2: memref<1024x128xbf16, #tpu.memory_space<vmem>>, %arg3: memref<16x128xf32, #tpu.memory_space<vmem>>) attributes {dimension_semantics = [#tpu.dimension_semantics<parallel>], iteration_bounds = array<i64: 2>, scalar_prefetch = 0 : i64, scratch_operands = 0 : i64, tpu.core_type = #tpu.core_type<tc>, window_params = [{transform_indices = @transform_0, window_bounds = array<i64: 16, 1024>}, {pipeline_mode = #tpu.pipeline_mode<synchronous>, transform_indices = @transform_1, window_bounds = array<i64: 1024, 128>}, {transform_indices = @transform_2, window_bounds = array<i64: 16, 128>}]} {
    %c0 = arith.constant 0 : index
    %c0_0 = arith.constant 0 : index
    %0 = vector.load %arg1[%c0, %c0_0] : memref<16x1024xbf16, #tpu.memory_space<vmem>>, vector<16x1024xbf16>
    %c0_1 = arith.constant 0 : index
    %c0_2 = arith.constant 0 : index
    %1 = vector.load %arg2[%c0_1, %c0_2] : memref<1024x128xbf16, #tpu.memory_space<vmem>>, vector<1024x128xbf16>
    %cst = arith.constant dense<0.000000e+00> : vector<16x128xf32>
    %2 = tpu.matmul %0, %1, %cst {dimension_numbers = #tpu.dot_dimension_numbers<[1], [0], [0], [1], [0, 0, 1, 1], [], []>} : vector<16x1024xbf16>, vector<1024x128xbf16>, vector<16x128xf32> -> vector<16x128xf32>
    %c0_3 = arith.constant 0 : index
    %c0_4 = arith.constant 0 : index
    %3 = vector.load %arg3[%c0_3, %c0_4] : memref<16x128xf32, #tpu.memory_space<vmem>>, vector<16x128xf32>
    tpu.vector_store %arg3[%c0_3, %c0_4], %2 {strides = array<i32>} : memref<16x128xf32, #tpu.memory_space<vmem>>, vector<16x128xf32>,
    return
  }
  func.func @transform_0(%arg0: i32) -> (i32, i32) {
    %c0_i32 = arith.constant 0 : i32
    %c0_i32_0 = arith.constant 0 : i32
    return %arg0, %c0_i32 : i32, i32
  }
  func.func @transform_1(%arg0: i32) -> (i32, i32) {
    %c0_i32 = arith.constant 0 : i32
    %c0_i32_0 = arith.constant 0 : i32
    %c0_i32_1 = arith.constant 0 : i32
    return %c0_i32, %c0_i32_0 : i32, i32
  }
  func.func @transform_2(%arg0: i32) -> (i32, i32) {
    %c0_i32 = arith.constant 0 : i32
    %c0_i32_0 = arith.constant 0 : i32
    return %arg0, %c0_i32 : i32, i32
  }
}

</mosaic_0001>

<bundles_post_ra>
// kernel: tpu_custom_call.1
= control target key start
LH: loop header
LB: loop body
LE: loop exit
PB: predicated region body
PF: predicated region fallthrough
CT: control target
= control target key end

     0   :  { %7 = vsyncpa [#allocation3], 0  ;;  %s1711_s0 = inlined_call_operand.hbm [shape: bf16[18,1024], index: 0, kind: input, shape index: {}]   ;;  %s1712_s1 = inlined_call_operand.hbm [shape: bf16[1024,128], index: 1, kind: input, shape index: {}]   ;;  %s1713_s2 = inlined_call_operand.hbm [shape: f32[18,128], index: 2, kind: output, shape index: {}]  }
   0x1   :  { %9 = vsyncpa [#allocation3 + $0x1], 0 }
   0x2   :  { %10 = vsyncpa [#allocation6], 0 }
   0x3   :  { %11 = vsyncpa [#allocation4], 0 }
   0x4   :  { %13 = vsyncpa [#allocation4 + $0x1], 0  ;;  %s1488_s9 = smov 0   ;;  %s1490_s10 = smov 0  }
   0x5   :  { %s1492_s11 = smov 0   ;;  %s1494_s12 = smov 0  }
   0x6 LB: > { %s1509_s13 = sadd.s32 4294967295, %s1462_s12   ;;  %s1026_s14 = sadd.s32 4294967294, %s1462_s12   ;;  %s1462_s12 = sphi %s1494_s12, %s1733_s12   ;;  %s1458_s11 = sphi %s1492_s11, %s1732_s11   ;;  %s1454_s10 = sphi %s1490_s10, %s1731_s10   ;;  %s1450_s9 = sphi %s1488_s9, %s1730_s9  }
   0x7   : > { %s1513_s15 = sadd.s32 1, %s1462_s12   ;;  %s26_s16 = sadd.s32 1, %s1458_s11 }
   0x8   : > { %s23_s17 = ssub.s32 %s1462_s12, %s1513_s15  ;;  %p33_p0 = scmp.ne.s32.totalorder %s1458_s11, %s1454_s10 }
   0x9   : > { %p24_p1 = scmp.eq.s32.totalorder %s23_s17, 0  ;;  %p34_p2 = scmp.eq.s32.totalorder %s1462_s12, 0 }
   0xa   : > { %p39_p3 = scmp.ne.s32.totalorder %s1454_s10, %s1450_s9  ;;  %p1714_p4 = scmp.eq.s32.totalorder %s1509_s13, 0 }
   0xb   : > { %s1525_s18 = scalar_select %p24_p1, %s1458_s11, %s26_s16  }
   0xc   : > { %p1527_p5 = por %p34_p2, %p33_p0  ;;  %p1533_p6 = por %p1714_p4, %p39_p3 }
   0xd   : > { %p84_p7 = scmp.eq.s32.totalorder %s1509_s13, 1  ;;  %p90_p8 = scmp.eq.s32.totalorder %s1026_s14, 1 }
   0xe   : > { %s1717_s19 = scalar_select %p1527_p5, 1, 0 }
   0xf   : > { %s1718_s20 = scalar_select %p1533_p6, 1, 0 }
  0x10   : > { %p1027_p9 = scmp.ge.s32.totalorder %s1462_s12, 1  ;;  %p97_p10 = scmp.lt.s32.totalorder %s1462_s12, 3 }
  0x11   : > { %p1540_p11 = por %p84_p7, %p33_p0  ;;  %p1544_p12 = por %p90_p8, %p39_p3 }
  0x12   : > { %p1548_p13 = pnand %p1027_p9, %p97_p10  ;;  %s1464_s24 = smov [#allocation5]  }
  0x13   : > { %s1719_s21 = scalar_select %p1540_p11, 1, 0 }
  0x14   : > { %s1720_s22 = scalar_select %p1544_p12, 1, 0 }
  0x15   : > { %s1721_s23 = scalar_select %p1548_p13, 1, 0 }
  0x16   : > { %p1222_p1 = pneg %p1548_p13  ;;  %s109_s25 = sshll.u32 %s1464_s24, 4  ;;  %s110_s25 = int_to_ptr.vmem [resolvable:$true] %s109_s25 }
  0x17   : > { %s1336_s29 = scalar_lea.hbm %s1712_s1, 8192 }
  0x18   : > { %p1556_p2 = pnand %p1222_p1, %p1714_p4  ;;  %p1337_p0 = scmp.ne.s32.totalorder %s1712_s1, %s1336_s29 }
  0x19   : > { %p1343_p9 = scmp.lt.u32.totalorder %s1336_s29, %s1712_s1 }
  0x1a   : > { %p1338_p3 = pneg %p1556_p2 }
  0x1c   : > { %p1339_p7 = pnand %p1338_p3, %p1337_p0 }
  0x1e   : > { %p1340_p8 = pneg %p1339_p7 }
  0x20   : > { %p1345_p10 = pnand %p1343_p9, %p1340_p8 }
  0x22   : > { %1348 = shalt.err (!%p1345_p10)
}
  0x23   : > { %s1349_s6 = scalar_lea.vmem %s110_s25, 8192  ;;  %p1357_p11 = scmp.lt.s32.totalorder %s110_s25, %s110_s25 }
  0x24   : > { %p1350_p1 = scmp.ne.s32.totalorder %s110_s25, %s1349_s6  ;;  %p1358_p6 = scmp.lt.s32.totalorder %s1349_s6, %s1349_s6 }
  0x26   : > { %p1352_p4 = pnand %p1350_p1, %p1338_p3  ;;  %p1359_p13 = por %p1358_p6, %p1357_p11 }
  0x28   : > { %p1353_p12 = pneg %p1352_p4 }
  0x2a   : > { %p1360_p5 = pnand %p1359_p13, %p1353_p12 }
  0x2c   : > { %1363 = shalt.err (!%p1360_p5)
}
  0x2d   : > { %s1465_s7 = smov 64   ;;  %s1466_s8 = smov 4  }
  0x2e   : > { %1225 = dma.hbm_to_vmem [thread:$0]  (!%p1556_p2), %s1712_s1, 8192, %s110_s25, [#allocation6], %s1465_s7, %s1465_s7, %s1466_s8  }
  0x2f   : > { %p1029_p0 = scmp.ge.s32.totalorder %s1462_s12, 2 }
  0x30   : > { %p1723_p4 = scmp.ne.s32.totalorder (!%p1029_p0), %s1717_s19, 0 }
  0x31   : > { %119 = sbr.rel (%p1029_p0) target bundleno = 91 (0x5b), region = 20 }
  0x38   : > { %122 = sbr.rel (!%p1723_p4) target bundleno = 91 (0x5b), region = 24  ;;  %s123_s17 = sand.u32 (%p1723_p4), 1, %s1458_s11  }
  0x39   : > { %s1031_s24 = sshll.u32 (%p1723_p4), %s1462_s12, 1  ;;  %s1030_s27 = sshll.u32 (%p1723_p4), %s123_s17, 6 }
  0x3a   : > { %s129_s28 = ssub.s32 (%p1723_p4), 3, %s1031_s24  ;;  %s1586_s29 = scalar_lea.sflag (%p1723_p4), [#allocation3], %s123_s17 }
  0x3b   : > { %p130_p5 = scmp.lt.s32.totalorder (%p1723_p4), %s129_s28, 2  ;;  %s127_s30 = scalar_lea.vmem (%p1723_p4), [#allocation2], %s1030_s27 }
  0x3f   : > { %s1735_s28 = smov (!%p130_p5, %s129_s28), 2 }
  0x40   : > { %s1583_s26 = sshll.u32 %s1735_s28, 9 }
  0x41   : > { %s135_s25 = ssub.s32 1024, %s1583_s26 }
  0x42   : > { %136 = vsyncadd %s1586_s29, %s135_s25  ;;  %p1034_p6 = scmp.ne.s32.totalorder %s1583_s26, 0  ;;  %s1126_s19 = sshll.u32 %s1462_s12, 10 }
  0x43   : > { %s1594_s5 = scalar_lea.hbm %s1711_s0, %s1126_s19  ;;  %s142_s6 = sshll.u32 %s127_s30, 4  ;;  %s1596_s6 = int_to_ptr.vmem [resolvable:$true] %s142_s6 }
  0x44   : > { %s1364_s7 = scalar_lea.hbm %s1594_s5, %s1583_s26  ;;  %s1368_s16 = scalar_lea.hbm %s1711_s0, 1536 }
  0x45   : > { %p1365_p11 = scmp.ne.s32.totalorder %s1594_s5, %s1364_s7  ;;  %p1369_p2 = scmp.lt.u32.totalorder %s1594_s5, %s1711_s0 }
  0x46   : > { %p1370_p3 = scmp.lt.u32.totalorder %s1368_s16, %s1364_s7  ;;  %p1372_p8 = scmp.lt.u32.totalorder %s1364_s7, %s1594_s5 }
  0x47   : > { %p1366_p12 = pnand %p1365_p11, %p1034_p6 }
  0x48   : > { %p1371_p7 = por %p1370_p3, %p1369_p2 }
  0x49   : > { %p1367_p13 = pneg %p1366_p12 }
  0x4a   : > { %p1373_p9 = por %p1372_p8, %p1371_p7 }
  0x4c   : > { %p1374_p10 = pnand %p1373_p9, %p1367_p13 }
  0x4e   : > { %1377 = shalt.err (!%p1374_p10)
}
  0x4f   : > { %s1378_s27 = scalar_lea.vmem %s1596_s6, %s1583_s26  ;;  %s1467_s28 = smov [#allocation2]  }
  0x50   : > { %p1379_p1 = scmp.ne.s32.totalorder %s1596_s6, %s1378_s27  ;;  %s1382_s25 = sshll.u32 %s1467_s28, 4  ;;  %s1383_s25 = int_to_ptr.vmem [resolvable:$false] %s1382_s25 }
  0x51   : > { %s1384_s30 = scalar_lea.vmem %s1383_s25, 2048  ;;  %p1385_p11 = scmp.lt.s32.totalorder %s1596_s6, %s1383_s25 }
  0x52   : > { %p1380_p4 = pnand %p1379_p1, %p1034_p6  ;;  %p1386_p12 = scmp.lt.s32.totalorder %s1384_s30, %s1378_s27 }
  0x54   : > { %p1381_p5 = pneg %p1380_p4  ;;  %p1387_p2 = por %p1386_p12, %p1385_p11 }
  0x56   : > { %p1388_p3 = pnand %p1387_p2, %p1381_p5 }
  0x58   : > { %1391 = shalt.err (!%p1388_p3)
}
  0x59   : > { %s1468_s19 = smov 512   ;;  %s1469_s3 = smov 32  }
  0x5a   : > { %148 = dma.hbm_to_vmem [thread:$0]  (%p1034_p6), %s1594_s5, %s1583_s26, %s1596_s6, %s1586_s29, %s1468_s19, %s1468_s19, %s1469_s3  }
  0x5b PF: > { %p1724_p13 = scmp.ne.s32.totalorder %s1721_s23, 0 }
  0x5c   : > { %s1626_s4 = sand.u32 (!%p1724_p13), 1, %s1454_s10   ;;  %p1725_p7 = scmp.ne.s32.totalorder (!%p1724_p13), %s1718_s20, 0 }
  0x5d   : > { %154 = sbr.rel (%p1724_p13) target bundleno = 420 (0x1a4), region = 28  ;;  %s1040_s7 = sshll.u32 (!%p1724_p13), %s1626_s4, 6 }
  0x5e   : > { %s157_s8 = scalar_lea.sflag (!%p1724_p13), [#allocation3], %s1626_s4  ;;  %s1630_s14 = scalar_lea.vmem (!%p1724_p13), [#allocation2], %s1040_s7 }
  0x64   : > { %1437 = dma.done.wait (%p1725_p7), %s157_s8, 1024  }
  0x65   : > { %1439 = vsyncadd (%p1725_p7), %s157_s8, 4294966272  ;;  %p1726_p6 = scmp.eq.s32.totalorder %s1509_s13, 0 }
  0x67   : > { %1441 = dma.done.wait (%p1726_p6), [#allocation6], 8192   ;;  %p1727_p8 = pmov %p1726_p6 }
  0x68   : > { %v1272_v0 = vld [vmem:[#allocation5 + $0x40] sm:$0xff]   ;;  %v1276_v4 = vld [vmem:[#allocation5 + $0x48] sm:$0xff]   ;;  %v1280_v8 = vld [vmem:[#allocation5 + $0x50] sm:$0xff]   ;;  %s1042_s20 = sshll.u32 %s1626_s4, 4  ;;  %s924_s26 = scalar_lea.sflag [#allocation4], %s1626_s4 }
  0x69   : > { %1443 = vsyncadd (%p1727_p8), [#allocation6], 4294959104  ;;  %v1273_v1 = vld [vmem:[#allocation5 + $0xc0] sm:$0xff]   ;;  %1128 = vmatprep.subr.bf16.mxu0 %v1272_v0  ;;  %v1277_v5 = vld [vmem:[#allocation5 + $0xc8] sm:$0xff]   ;;  %s184_s23 = scalar_lea.vmem [#allocation7], %s1042_s20  ;;  %p1728_p9 = scmp.ne.s32.totalorder %s1719_s21, 0 }
  0x6a   : > { %v1274_v2 = vld [vmem:[#allocation5] sm:$0xff]   ;;  %1150 = vmatprep.subr.bf16.mxu1 %v1273_v1  ;;  %v1278_v6 = vld [vmem:[#allocation5 + $0x8] sm:$0xff]   ;;  %v1281_v9 = vld [vmem:[#allocation5 + $0xd0] sm:$0xff]   ;;  %s1116_s29 = sshll.u32 (%p1728_p9), %s1509_s13, 1 }
  0x6b   : > { %v1275_v3 = vld [vmem:[#allocation5 + $0x80] sm:$0xff]   ;;  %1129 = vmatpush3.bf16.msra.mxu0 %v1274_v2  ;;  %v1279_v7 = vld [vmem:[#allocation5 + $0x88] sm:$0xff]   ;;  %v1282_v10 = vld [vmem:[#allocation5 + $0x10] sm:$0xff]   ;;  %s932_s5 = ssub.s32 (%p1728_p9), 3, %s1116_s29 }
  0x6c   : > { %1151 = vmatpush3.bf16.msra.mxu1 %v1275_v3  ;;  %1130 = vmatprep.subr.bf16.mxu0 %v1276_v4  ;;  %v1283_v11 = vld [vmem:[#allocation5 + $0x90] sm:$0xff]   ;;  %v1284_v12 = vld [vmem:[#allocation5 + $0x58] sm:$0xff]   ;;  %v1288_v16 = vld [vmem:[#allocation5 + $0x60] sm:$0xff]   ;;  %p933_p10 = scmp.lt.s32.totalorder (%p1728_p9), %s932_s5, 2 }
  0x6d   : > { %1152 = vmatprep.subr.bf16.mxu1 %v1277_v5  ;;  %v1285_v13 = vld [vmem:[#allocation5 + $0xd8] sm:$0xff]   ;;  %v1289_v17 = vld [vmem:[#allocation5 + $0xe0] sm:$0xff]   ;;  %v1292_v20 = vld [vmem:[#allocation5 + $0x68] sm:$0xff]  }
  0x6e   : > { %v1286_v14 = vld [vmem:[#allocation5 + $0x18] sm:$0xff]   ;;  %v1290_v18 = vld [vmem:[#allocation5 + $0x20] sm:$0xff]   ;;  %v1293_v21 = vld [vmem:[#allocation5 + $0xe8] sm:$0xff]  }
  0x6f   : > { %1131 = vmatpush3.bf16.msra.mxu0 %v1278_v6  ;;  %v1287_v15 = vld [vmem:[#allocation5 + $0x98] sm:$0xff]   ;;  %v1291_v19 = vld [vmem:[#allocation5 + $0xa0] sm:$0xff]   ;;  %v1294_v22 = vld [vmem:[#allocation5 + $0x28] sm:$0xff]  }
  0x70   : > { %1153 = vmatpush3.bf16.msra.mxu1 %v1279_v7  ;;  %1132 = vmatprep.subr.bf16.mxu0 %v1280_v8  ;;  %v1295_v23 = vld [vmem:[#allocation5 + $0xa8] sm:$0xff]   ;;  %v1296_v24 = vld [vmem:[#allocation5 + $0x70] sm:$0xff]   ;;  %v1300_v28 = vld [vmem:[#allocation5 + $0x78] sm:$0xff]  }
  0x71   : > { %1154 = vmatprep.subr.bf16.mxu1 %v1281_v9  ;;  %v1297_v25 = vld [vmem:[#allocation5 + $0xf0] sm:$0xff]   ;;  %v1301_v29 = vld [vmem:[#allocation5 + $0xf8] sm:$0xff]   ;;  %v197_v32 = vld [vmem:[%s1630_s14] sm:$0xff] }
  0x72   : > { %v1298_v26 = vld [vmem:[#allocation5 + $0x30] sm:$0xff]   ;;  %v1302_v30 = vld [vmem:[#allocation5 + $0x38] sm:$0xff]   ;;  %v201_v33 = vld [vmem:[%s1630_s14 + $0x20] sm:$0xff] }
  0x73   : > { %1133 = vmatpush3.bf16.msra.mxu0 %v1282_v10  ;;  %v1299_v27 = vld [vmem:[#allocation5 + $0xb0] sm:$0xff]   ;;  %v1303_v31 = vld [vmem:[#allocation5 + $0xb8] sm:$0xff]   ;;  %v198_v34 = vld [vmem:[%s1630_s14 + $0x8] sm:$0xff]  ;;  %v1043_v35 = vcombine.low %v197_v32, %v201_v33  ;;  %v1044_v36 = vcombine.high %v197_v32, %v201_v33 }
  0x74   : > { %1155 = vmatpush3.bf16.msra.mxu1 %v1283_v11  ;;  %1134 = vmatprep.subr.bf16.mxu0 %v1284_v12  ;;  %v202_v37 = vld [vmem:[%s1630_s14 + $0x28] sm:$0xff]  ;;  %v1304_v40 = vld [vmem:[#allocation5 + $0x140] sm:$0xff]   ;;  %v1312_v48 = vld [vmem:[#allocation5 + $0x150] sm:$0xff]  }
  0x75   : > { %1156 = vmatprep.subr.bf16.mxu1 %v1285_v13  ;;  %v1045_v38 = vcombine.low %v198_v34, %v202_v37  ;;  %v1046_v39 = vcombine.high %v198_v34, %v202_v37  ;;  %789 = vmatprep.mubr.bf16.mxu0 %v1044_v36  ;;  %v1305_v41 = vld [vmem:[#allocation5 + $0x1c0] sm:$0xff]   ;;  %v1308_v44 = vld [vmem:[#allocation5 + $0x148] sm:$0xff]   ;;  %v1313_v49 = vld [vmem:[#allocation5 + $0x1d0] sm:$0xff]  }
  0x76   : > { %v1306_v42 = vld [vmem:[#allocation5 + $0x100] sm:$0xff]   ;;  %v1309_v45 = vld [vmem:[#allocation5 + $0x1c8] sm:$0xff]   ;;  %v1314_v50 = vld [vmem:[#allocation5 + $0x110] sm:$0xff]  }
  0x77   : > { %1135 = vmatpush3.bf16.msra.mxu0 %v1286_v14  ;;  %830 = vmatprep.mubr.bf16.mxu1 %v1046_v39  ;;  %v1307_v43 = vld [vmem:[#allocation5 + $0x180] sm:$0xff]   ;;  %v1310_v46 = vld [vmem:[#allocation5 + $0x108] sm:$0xff]   ;;  %v1315_v51 = vld [vmem:[#allocation5 + $0x190] sm:$0xff]  }
  0x78   : > { %1157 = vmatpush3.bf16.msra.mxu1 %v1287_v15  ;;  %1136 = vmatprep.subr.bf16.mxu0 %v1288_v16  ;;  %v1311_v47 = vld [vmem:[#allocation5 + $0x188] sm:$0xff]   ;;  %v1316_v52 = vld [vmem:[#allocation5 + $0x158] sm:$0xff]   ;;  %v1320_v56 = vld [vmem:[#allocation5 + $0x160] sm:$0xff]  }
  0x79   : > { %1158 = vmatprep.subr.bf16.mxu1 %v1289_v17  ;;  %v1317_v53 = vld [vmem:[#allocation5 + $0x1d8] sm:$0xff]   ;;  %v1321_v57 = vld [vmem:[#allocation5 + $0x1e0] sm:$0xff]   ;;  %v1324_v60 = vld [vmem:[#allocation5 + $0x168] sm:$0xff]  }
  0x7a   : > { %v1318_v54 = vld [vmem:[#allocation5 + $0x118] sm:$0xff]   ;;  %v1322_v58 = vld [vmem:[#allocation5 + $0x120] sm:$0xff]   ;;  %v1325_v61 = vld [vmem:[#allocation5 + $0x1e8] sm:$0xff]  }
  0x7b   : > { %1137 = vmatpush3.bf16.msra.mxu0 %v1290_v18  ;;  %v1319_v55 = vld [vmem:[#allocation5 + $0x198] sm:$0xff]   ;;  %v1323_v59 = vld [vmem:[#allocation5 + $0x1a0] sm:$0xff]   ;;  %v1326_v62 = vld [vmem:[#allocation5 + $0x128] sm:$0xff]  }
  0x7c   : > { %1159 = vmatpush3.bf16.msra.mxu1 %v1291_v19  ;;  %1138 = vmatprep.subr.bf16.mxu0 %v1292_v20  ;;  %v1327_v63 = vld [vmem:[#allocation5 + $0x1a8] sm:$0xff]   ;;  %v1328_v0 = vld [vmem:[#allocation5 + $0x170] sm:$0xff]   ;;  %v1332_v4 = vld [vmem:[#allocation5 + $0x178] sm:$0xff]  }
  0x7d   : > { %1160 = vmatprep.subr.bf16.mxu1 %v1293_v21  ;;  %v1329_v1 = vld [vmem:[#allocation5 + $0x1f0] sm:$0xff]   ;;  %v1333_v5 = vld [vmem:[#allocation5 + $0x1f8] sm:$0xff]  }
  0x7e   : > { %v1330_v2 = vld [vmem:[#allocation5 + $0x130] sm:$0xff]   ;;  %v1334_v6 = vld [vmem:[#allocation5 + $0x138] sm:$0xff]  }
  0x7f   : > { %1139 = vmatpush3.bf16.msra.mxu0 %v1294_v22  ;;  %v1331_v3 = vld [vmem:[#allocation5 + $0x1b0] sm:$0xff]   ;;  %v1335_v7 = vld [vmem:[#allocation5 + $0x1b8] sm:$0xff]  }
  0x80   : > { %1161 = vmatpush3.bf16.msra.mxu1 %v1295_v23  ;;  %1140 = vmatprep.subr.bf16.mxu0 %v1296_v24  ;;  %v199_v8 = vld [vmem:[%s1630_s14 + $0x10] sm:$0xff]  ;;  %v200_v12 = vld [vmem:[%s1630_s14 + $0x18] sm:$0xff] }
  0x81   : > { %1162 = vmatprep.subr.bf16.mxu1 %v1297_v25  ;;  %v203_v9 = vld [vmem:[%s1630_s14 + $0x30] sm:$0xff]  ;;  %v204_v13 = vld [vmem:[%s1630_s14 + $0x38] sm:$0xff] }
  0x82   : > { %v1047_v10 = vcombine.low %v199_v8, %v203_v9  ;;  %v1048_v11 = vcombine.high %v199_v8, %v203_v9  ;;  %v1049_v14 = vcombine.low %v200_v12, %v204_v13  ;;  %v1050_v15 = vcombine.high %v200_v12, %v204_v13 }
  0x83   : > { %1141 = vmatpush3.bf16.msra.mxu0 %v1298_v26 }
  0x84   : > { %1163 = vmatpush3.bf16.msra.mxu1 %v1299_v27  ;;  %1142 = vmatprep.subr.bf16.mxu0 %v1300_v28 }
  0x85   : > { %1164 = vmatprep.subr.bf16.mxu1 %v1301_v29 }
  0x87   : > { %1143 = vmatpush3.bf16.msra.mxu0 %v1302_v30 }
  0x88   : > { %1165 = vmatpush3.bf16.msra.mxu1 %v1303_v31  ;;  %1172 = vmatprep.subr.bf16.mxu0 %v1304_v40 }
  0x89   : > { %1194 = vmatprep.subr.bf16.mxu1 %v1305_v41 }
  0x8a   : > { %790 = vmatmul.mubr.bf16.vlgmr.msra.gmra.mrb[0].mxu0 %v1043_v35 }
  0x8b   : > { %831 = vmatmul.mubr.bf16.vlgmr.msra.gmra.mrb[0].mxu1 %v1045_v38  ;;  %1173 = vmatpush3.bf16.msra.mxu0 %v1306_v42 }
  0x8c   : > { %1195 = vmatpush3.bf16.msra.mxu1 %v1307_v43  ;;  %1174 = vmatprep.subr.bf16.mxu0 %v1308_v44 }
  0x8d   : > { %1196 = vmatprep.subr.bf16.mxu1 %v1309_v45  ;;  %871 = vmatprep.mubr.bf16.mxu0 %v1048_v11 }
  0x8e   : > { %912 = vmatprep.mubr.bf16.mxu1 %v1050_v15 }
  0x8f   : > { %1175 = vmatpush3.bf16.msra.mxu0 %v1310_v46 }
  0x90   : > { %1197 = vmatpush3.bf16.msra.mxu1 %v1311_v47  ;;  %1176 = vmatprep.subr.bf16.mxu0 %v1312_v48 }
  0x91   : > { %1198 = vmatprep.subr.bf16.mxu1 %v1313_v49 }
  0x93   : > { %1177 = vmatpush3.bf16.msra.mxu0 %v1314_v50 }
  0x94   : > { %1199 = vmatpush3.bf16.msra.mxu1 %v1315_v51  ;;  %1178 = vmatprep.subr.bf16.mxu0 %v1316_v52 }
  0x95   : > { %1200 = vmatprep.subr.bf16.mxu1 %v1317_v53 }
  0x97   : > { %1179 = vmatpush3.bf16.msra.mxu0 %v1318_v54 }
  0x98   : > { %1201 = vmatpush3.bf16.msra.mxu1 %v1319_v55  ;;  %1180 = vmatprep.subr.bf16.mxu0 %v1320_v56 }
  0x99   : > { %1202 = vmatprep.subr.bf16.mxu1 %v1321_v57 }
  0x9b   : > { %1181 = vmatpush3.bf16.msra.mxu0 %v1322_v58 }
  0x9c   : > { %1203 = vmatpush3.bf16.msra.mxu1 %v1323_v59  ;;  %1182 = vmatprep.subr.bf16.mxu0 %v1324_v60 }
  0x9d   : > { %1204 = vmatprep.subr.bf16.mxu1 %v1325_v61 }
  0x9f   : > { %1183 = vmatpush3.bf16.msra.mxu0 %v1326_v62 }
  0xa0   : > { %1205 = vmatpush3.bf16.msra.mxu1 %v1327_v63  ;;  %1184 = vmatprep.subr.bf16.mxu0 %v1328_v0 }
  0xa1   : > { %1206 = vmatprep.subr.bf16.mxu1 %v1329_v1 }
  0xa3   : > { %1185 = vmatpush3.bf16.msra.mxu0 %v1330_v2 }
  0xa4   : > { %1207 = vmatpush3.bf16.msra.mxu1 %v1331_v3  ;;  %1186 = vmatprep.subr.bf16.mxu0 %v1332_v4 }
  0xa5   : > { %1208 = vmatprep.subr.bf16.mxu1 %v1333_v5 }
  0xa7   : > { %1187 = vmatpush3.bf16.msra.mxu0 %v1334_v6 }
  0xa8   : > { %1209 = vmatpush3.bf16.msra.mxu1 %v1335_v7 }
  0xaa   : > { %872 = vmatmul.mubr.bf16.vlgmr.msra.gmra.mrb[4].mxu0 %v1047_v10 }
  0xab   : > { %913 = vmatmul.mubr.bf16.vlgmr.msra.gmra.mrb[4].mxu1 %v1049_v14 }
 0x15d   : > { %v1144_v16 = vpop.f32.mrb[0].mxu0 }
 0x15e   : > { %v1166_v17 = vpop.f32.mrb[0].mxu1  ;;  %v1145_v18 = vpop.f32.mrb[1].mxu0 }
 0x15f   : > { %v1146_v19 = vadd.f32 %v1145_v18, %v1144_v16  ;;  %v1167_v20 = vpop.f32.mrb[1].mxu1  ;;  %v1147_v21 = vpop.f32.mrb[2].mxu0 }
 0x160   : > { %v1168_v22 = vadd.f32 %v1167_v20, %v1166_v17  ;;  %v1169_v23 = vpop.f32.mrb[2].mxu1  ;;  %v1148_v24 = vpop.f32.mrb[3].mxu0 }
 0x161   : > { %v1149_v25 = vadd.f32 %v1148_v24, %v1147_v21  ;;  %v1170_v26 = vpop.f32.mrb[3].mxu1 }
 0x162   : > { %v833_v27 = vadd.f32 %v1168_v22, %v1146_v19  ;;  %v1171_v28 = vadd.f32 %v1170_v26, %v1169_v23 }
 0x164   : > { %v836_v29 = vadd.f32 %v1171_v28, %v1149_v25 }
 0x17d   : > { %v1188_v30 = vpop.f32.mrb[4].mxu0 }
 0x17e   : > { %v1210_v31 = vpop.f32.mrb[4].mxu1  ;;  %v1189_v32 = vpop.f32.mrb[5].mxu0 }
 0x17f   : > { %v1190_v33 = vadd.f32 %v1189_v32, %v1188_v30  ;;  %v1211_v34 = vpop.f32.mrb[5].mxu1  ;;  %v1191_v35 = vpop.f32.mrb[6].mxu0 }
 0x180   : > { %v1212_v36 = vadd.f32 %v1211_v34, %v1210_v31  ;;  %v1213_v37 = vpop.f32.mrb[6].mxu1  ;;  %v1192_v38 = vpop.f32.mrb[7].mxu0 }
 0x181   : > { %v874_v39 = vadd.f32 %v1190_v33, %v833_v27  ;;  %v1193_v40 = vadd.f32 %v1192_v38, %v1191_v35  ;;  %v1214_v41 = vpop.f32.mrb[7].mxu1  ;;  %930 = sbr.rel (!%p1728_p9) target bundleno = 420 (0x1a4), region = 40 }
 0x182   : > { %v1215_v42 = vadd.f32 %v1214_v41, %v1213_v37 }
 0x183   : > { %v915_v43 = vadd.f32 %v1212_v36, %v874_v39  ;;  %v877_v44 = vadd.f32 %v1193_v40, %v836_v29 }
 0x185   : > { %921 = vst [vmem:[%s184_s23] sm:$0xff] %v915_v43  ;;  %v918_v45 = vadd.f32 %v1215_v42, %v877_v44 }
 0x187   : > { %922 = vst [vmem:[%s184_s23 + $0x8] sm:$0xff] %v918_v45 }
 0x188   : > { %s1737_s5 = smov (!%p933_p10, %s932_s5), 2 }
 0x189   : > { %s1653_s6 = sshll.u32 %s1737_s5, 7 }
 0x18a   : > { %s937_s16 = ssub.s32 256, %s1653_s6 }
 0x18b   : > { %938 = vsyncadd %s924_s26, %s937_s16  ;;  %p1118_p1 = scmp.ne.s32.totalorder %s1653_s6, 0  ;;  %s1127_s17 = sshll.u32 %s1509_s13, 8 }
 0x18c   : > { %s1663_s27 = scalar_lea.hbm %s1713_s2, %s1127_s17  ;;  %s943_s28 = sshll.u32 %s184_s23, 4  ;;  %s1665_s28 = int_to_ptr.vmem [resolvable:$true] %s943_s28 }
 0x18d   : > { %s1392_s25 = scalar_lea.vmem %s1665_s28, %s1653_s6  ;;  %s1470_s30 = smov [#allocation7]  }
 0x18e   : > { %p1393_p4 = scmp.ne.s32.totalorder %s1665_s28, %s1392_s25  ;;  %s1396_s19 = sshll.u32 %s1470_s30, 4  ;;  %s1397_s19 = int_to_ptr.vmem [resolvable:$false] %s1396_s19 }
 0x18f   : > { %s1398_s13 = scalar_lea.vmem %s1397_s19, 512  ;;  %p1399_p12 = scmp.lt.s32.totalorder %s1665_s28, %s1397_s19 }
 0x190   : > { %p1394_p5 = pnand %p1393_p4, %p1118_p1  ;;  %p1400_p2 = scmp.lt.s32.totalorder %s1398_s13, %s1392_s25 }
 0x192   : > { %p1395_p11 = pneg %p1394_p5  ;;  %p1401_p3 = por %p1400_p2, %p1399_p12 }
 0x194   : > { %p1402_p13 = pnand %p1401_p3, %p1395_p11 }
 0x196   : > { %1405 = shalt.err (!%p1402_p13)
}
 0x197   : > { %s1406_s3 = scalar_lea.hbm %s1663_s27, %s1653_s6  ;;  %s1410_s14 = scalar_lea.hbm %s1713_s2, 384 }
 0x198   : > { %p1407_p7 = scmp.ne.s32.totalorder %s1663_s27, %s1406_s3  ;;  %p1411_p9 = scmp.lt.u32.totalorder %s1663_s27, %s1713_s2 }
 0x199   : > { %p1412_p10 = scmp.lt.u32.totalorder %s1410_s14, %s1406_s3  ;;  %p1414_p5 = scmp.lt.u32.totalorder %s1406_s3, %s1663_s27 }
 0x19a   : > { %p1408_p6 = pnand %p1407_p7, %p1118_p1 }
 0x19b   : > { %p1413_p4 = por %p1412_p10, %p1411_p9 }
 0x19c   : > { %p1409_p8 = pneg %p1408_p6 }
 0x19d   : > { %p1415_p11 = por %p1414_p5, %p1413_p4 }
 0x19f   : > { %p1416_p12 = pnand %p1415_p11, %p1409_p8 }
 0x1a1   : > { %1419 = shalt.err (!%p1416_p12)
}
 0x1a2   : > { %s1471_s29 = smov 128   ;;  %s1472_s5 = smov 8  }
 0x1a3   : > { %949 = dma.vmem_to_hbm [thread:$0]  (%p1118_p1), %s1665_s28, %s1653_s6, %s1663_s27, %s924_s26, %s1471_s29, %s1471_s29, %s1472_s5  }
 0x1a4 PF: > { %s958_s16 = sand.u32 1, %s1450_s9   ;;  %p1729_p2 = scmp.ne.s32.totalorder %s1720_s22, 0 }
 0x1a5   : > { %s959_s17 = scalar_lea.sflag [#allocation4], %s958_s16 }
 0x1a6   : > { %p1227_p3 = pnand %p1029_p0, %p1729_p2 }
 0x1a8   : > { %1445 = dma.done.wait (!%p1227_p3), %s959_s17, 256  }
 0x1a9   : > { %1447 = vsyncadd (!%p1227_p3), %s959_s17, 4294967040  ;;  %p16_p13 = scmp.ge.s32.totalorder %s1513_s15, 4   ;;  %s1730_s9 = smov %s1454_s10 }
 0x1aa   : > { %s1731_s10 = smov %s1458_s11  ;;  %s1732_s11 = smov %s1525_s18 }
 0x1ab   : > { %s1733_s12 = smov %s1513_s15  ;;  %18 = sbr.rel (!%p16_p13) target bundleno = 6 (0x6), region = 77 }
 0x1b2   :  { %964 = vsyncpa [#allocation3], 1 }
 0x1b3   :  { %966 = vsyncpa [#allocation3 + $0x1], 1 }
 0x1b4   :  { %967 = vsyncpa [#allocation6], 1 }
 0x1b5   :  { %968 = vsyncpa [#allocation4], 1 }
 0x1b6   :  { %970 = vsyncpa [#allocation4 + $0x1], 1 }

</bundles_post_ra>
